<compile_context>
chip_gen: v7x
topology: tpu7x:2x2x1
jax: 0.10.0
libtpu: 0.0.40
codegen_flags: <defaults>
</compile_context>

<pallas_src>
import functools

import jax
import jax.numpy as jnp
from jax.experimental import pallas as pl
from jax.experimental.pallas import tpu as pltpu

LANE = 128     # vreg lane width (last dim)
SUBLANE = 8    # vreg sublane width (second-to-last dim)


def _round_up(x, m):
    return (x + m - 1) // m * m


def _cdiv(a, b):
    return -(-a // b)


def mlp_kernel(x_ref, w1_ref, b1_ref, w2_ref, b2_ref, o_ref):
    # Fused fc1 + ReLU + fc2 on one batch tile, all operands in VMEM.
    x = x_ref[...]
    h = jnp.dot(x, w1_ref[...], preferred_element_type=jnp.float32) + b1_ref[...]
    h = jnp.maximum(h, 0.0)
    y = jnp.dot(h, w2_ref[...], preferred_element_type=jnp.float32) + b2_ref[...]
    o_ref[...] = y.astype(o_ref.dtype)


def pad_params(w1, b1, w2, b2):
    """One-time (init-time) padding of the hidden dim to the 128-lane width.

    Exact: padded hidden lanes compute relu(0 + 0) = 0 and multiply zero rows
    of w2, so they contribute nothing. out_dim / data_dim are NOT padded.
    """
    data_dim, hidden_dim = w1.shape
    out_dim = w2.shape[1]
    hp = _round_up(hidden_dim, LANE)
    f32 = jnp.float32
    w1_p = jnp.zeros((data_dim, hp), f32).at[:, :hidden_dim].set(w1.astype(f32))
    b1_p = jnp.zeros((1, hp), f32).at[:, :hidden_dim].set(b1.astype(f32))
    w2_p = jnp.zeros((hp, out_dim), f32).at[:hidden_dim, :].set(w2.astype(f32))
    b2_p = b2.astype(f32).reshape(1, out_dim)
    return w1_p, b1_p, w2_p, b2_p


@functools.partial(jax.jit, static_argnames=("tile_m",))
def net_forward(x, w1_p, b1_p, w2_p, b2_p, *, tile_m=1024):
    """y = relu(x @ w1 + b1) @ w2 + b2, computed with a Pallas TPU kernel.

    x:    (batch, data_dim) float
    w1_p: (data_dim, hp) pre-padded, b1_p: (1, hp)
    w2_p: (hp, out_dim),             b2_p: (1, out_dim)
    """
    batch, data_dim = x.shape
    hp = w1_p.shape[1]
    out_dim = w2_p.shape[1]

    # Balanced batch tiling (static Python at trace time): split the batch into
    # the fewest tiles of size <= tile_m, each rounded to the 8-row sublane.
    num_tiles = max(1, _cdiv(batch, tile_m))
    tm = _round_up(_cdiv(batch, num_tiles), SUBLANE)
    grid = (_cdiv(batch, tm),)

    return pl.pallas_call(
        mlp_kernel,
        out_shape=jax.ShapeDtypeStruct((batch, out_dim), jnp.float32),
        grid_spec=pltpu.PrefetchScalarGridSpec(
            num_scalar_prefetch=0,
            grid=grid,
            in_specs=[
                # Activation tile marches over the batch; full (unpadded)
                # feature dim as the last block dim.
                pl.BlockSpec((tm, data_dim), lambda i: (i, 0)),
                # Weights / biases stay VMEM-resident across grid steps.
                pl.BlockSpec((data_dim, hp), lambda i: (0, 0)),
                pl.BlockSpec((1, hp), lambda i: (0, 0)),
                pl.BlockSpec((hp, out_dim), lambda i: (0, 0)),
                pl.BlockSpec((1, out_dim), lambda i: (0, 0)),
            ],
            # Output is unpadded in the lane dim: full-dim last block dim.
            out_specs=pl.BlockSpec((tm, out_dim), lambda i: (i, 0)),
        ),
        compiler_params=pltpu.CompilerParams(
            dimension_semantics=("parallel",),   # v7x: shard batch over 2 TCs
            vmem_limit_bytes=32 * 1024 * 1024,
        ),
    )(x.astype(jnp.float32), w1_p, b1_p, w2_p, b2_p)


def init_linear_params(key, in_dim, out_dim):
    # Mimic PyTorch nn.Linear default init: U(-1/sqrt(in), 1/sqrt(in)).
    k_w, k_b = jax.random.split(key)
    bound = 1.0 / jnp.sqrt(jnp.float32(in_dim))
    # Stored as (in, out): transpose of PyTorch's (out, in) weight.
    w = jax.random.uniform(k_w, (in_dim, out_dim), jnp.float32, -bound, bound)
    b = jax.random.uniform(k_b, (1, out_dim), jnp.float32, -bound, bound)
    return w, b


if __name__ == "__main__":
    data_dim, hidden_dim, out_dim = 12, 32, 8
    batch = 8

    key = jax.random.PRNGKey(0)
    k_x, k_fc1, k_fc2 = jax.random.split(key, 3)

    x = jax.random.normal(k_x, (batch, data_dim), jnp.float32)
    w1, b1 = init_linear_params(k_fc1, data_dim, hidden_dim)
    w2, b2 = init_linear_params(k_fc2, hidden_dim, out_dim)

    # Pad weights once (hoisted out of the forward path).
    params = pad_params(w1, b1, w2, b2)

    out = net_forward(x, *params)
    jax.block_until_ready(out)

    # Reference check in plain JAX (unpadded weights).
    ref = jnp.maximum(x @ w1 + b1, 0.0) @ w2 + b2
    assert out.shape == (batch, out_dim)
    assert jnp.allclose(out, ref, atol=1e-5, rtol=1e-5)

    print("KERNEL_OK")
</pallas_src>

<mosaic_0001>
module attributes {stable_mosaic.version = 11 : i64} {
  func.func @mlp_kernel(%arg0: i32, %arg1: memref<8x12xf32, #tpu.memory_space<vmem>>, %arg2: memref<12x128xf32, #tpu.memory_space<vmem>>, %arg3: memref<1x128xf32, #tpu.memory_space<vmem>>, %arg4: memref<128x8xf32, #tpu.memory_space<vmem>>, %arg5: memref<1x8xf32, #tpu.memory_space<vmem>>, %arg6: memref<8x8xf32, #tpu.memory_space<vmem>>) attributes {dimension_semantics = [#tpu.dimension_semantics<parallel>], iteration_bounds = array<i64: 1>, scalar_prefetch = 0 : i64, scratch_operands = 0 : i64, tpu.core_type = #tpu.core_type<tc>, window_params = [{transform_indices = @transform_0, window_bounds = array<i64: 8, 12>}, {pipeline_mode = #tpu.pipeline_mode<synchronous>, transform_indices = @transform_1, window_bounds = array<i64: 12, 128>}, {pipeline_mode = #tpu.pipeline_mode<synchronous>, transform_indices = @transform_2, window_bounds = array<i64: 1, 128>}, {pipeline_mode = #tpu.pipeline_mode<synchronous>, transform_indices = @transform_3, window_bounds = array<i64: 128, 8>}, {pipeline_mode = #tpu.pipeline_mode<synchronous>, transform_indices = @transform_4, window_bounds = array<i64: 1, 8>}, {transform_indices = @transform_5, window_bounds = array<i64: 8, 8>}]} {
    %c0 = arith.constant 0 : index
    %c0_0 = arith.constant 0 : index
    %0 = vector.load %arg1[%c0, %c0_0] : memref<8x12xf32, #tpu.memory_space<vmem>>, vector<8x12xf32>
    %c0_1 = arith.constant 0 : index
    %c0_2 = arith.constant 0 : index
    %1 = vector.load %arg2[%c0_1, %c0_2] : memref<12x128xf32, #tpu.memory_space<vmem>>, vector<12x128xf32>
    %cst = arith.constant dense<0.000000e+00> : vector<8x128xf32>
    %2 = tpu.matmul %0, %1, %cst {dimension_numbers = #tpu.dot_dimension_numbers<[1], [0], [0], [1], [0, 0, 1, 1], [], []>} : vector<8x12xf32>, vector<12x128xf32>, vector<8x128xf32> -> vector<8x128xf32>
    %c0_3 = arith.constant 0 : index
    %c0_4 = arith.constant 0 : index
    %3 = vector.load %arg3[%c0_3, %c0_4] : memref<1x128xf32, #tpu.memory_space<vmem>>, vector<1x128xf32>
    %4 = vector.broadcast %3 : vector<1x128xf32> to vector<8x128xf32>
    %5 = arith.addf %2, %4 : vector<8x128xf32>
    %cst_5 = arith.constant 0.000000e+00 : f32
    %6 = vector.broadcast %cst_5 : f32 to vector<8x128xf32>
    %7 = arith.maximumf %5, %6 : vector<8x128xf32>
    %c0_6 = arith.constant 0 : index
    %c0_7 = arith.constant 0 : index
    %8 = vector.load %arg4[%c0_6, %c0_7] : memref<128x8xf32, #tpu.memory_space<vmem>>, vector<128x8xf32>
    %cst_8 = arith.constant dense<0.000000e+00> : vector<8x8xf32>
    %9 = tpu.matmul %7, %8, %cst_8 {dimension_numbers = #tpu.dot_dimension_numbers<[1], [0], [0], [1], [0, 0, 1, 1], [], []>} : vector<8x128xf32>, vector<128x8xf32>, vector<8x8xf32> -> vector<8x8xf32>
    %c0_9 = arith.constant 0 : index
    %c0_10 = arith.constant 0 : index
    %10 = vector.load %arg5[%c0_9, %c0_10] : memref<1x8xf32, #tpu.memory_space<vmem>>, vector<1x8xf32>
    %11 = vector.broadcast %10 : vector<1x8xf32> to vector<8x8xf32>
    %12 = arith.addf %9, %11 : vector<8x8xf32>
    %c0_11 = arith.constant 0 : index
    %c0_12 = arith.constant 0 : index
    %13 = vector.load %arg6[%c0_11, %c0_12] : memref<8x8xf32, #tpu.memory_space<vmem>>, vector<8x8xf32>
    tpu.vector_store %arg6[%c0_11, %c0_12], %12 {strides = array<i32>} : memref<8x8xf32, #tpu.memory_space<vmem>>, vector<8x8xf32>,
    return
  }
  func.func @transform_0(%arg0: i32) -> (i32, i32) {
    %c0_i32 = arith.constant 0 : i32
    %c0_i32_0 = arith.constant 0 : i32
    return %arg0, %c0_i32 : i32, i32
  }
  func.func @transform_1(%arg0: i32) -> (i32, i32) {
    %c0_i32 = arith.constant 0 : i32
    %c0_i32_0 = arith.constant 0 : i32
    %c0_i32_1 = arith.constant 0 : i32
    return %c0_i32, %c0_i32_0 : i32, i32
  }
  func.func @transform_2(%arg0: i32) -> (i32, i32) {
    %c0_i32 = arith.constant 0 : i32
    %c0_i32_0 = arith.constant 0 : i32
    %c0_i32_1 = arith.constant 0 : i32
    return %c0_i32, %c0_i32_0 : i32, i32
  }
  func.func @transform_3(%arg0: i32) -> (i32, i32) {
    %c0_i32 = arith.constant 0 : i32
    %c0_i32_0 = arith.constant 0 : i32
    %c0_i32_1 = arith.constant 0 : i32
    return %c0_i32, %c0_i32_0 : i32, i32
  }
  func.func @transform_4(%arg0: i32) -> (i32, i32) {
    %c0_i32 = arith.constant 0 : i32
    %c0_i32_0 = arith.constant 0 : i32
    %c0_i32_1 = arith.constant 0 : i32
    return %c0_i32, %c0_i32_0 : i32, i32
  }
  func.func @transform_5(%arg0: i32) -> (i32, i32) {
    %c0_i32 = arith.constant 0 : i32
    %c0_i32_0 = arith.constant 0 : i32
    return %arg0, %c0_i32 : i32, i32
  }
}

</mosaic_0001>

<bundles_post_ra>
// kernel: net_forward.1
= control target key start
LH: loop header
LB: loop body
LE: loop exit
PB: predicated region body
PF: predicated region fallthrough
CT: control target
= control target key end

     0   :  { %vm35_vm0 = vcmask 1043456   ;;  %v342_v2 = vmov 0.0|0.0   ;;  %vm343_vm1 = vmmov 1   ;;  %vm344_vm3 = vmmov 0   ;;  %s452_s0 = inlined_call_operand.vmem [shape: f32[8,12], index: 0, kind: input, shape index: {}]   ;;  %s453_s1 = inlined_call_operand.vmem [shape: f32[12,128], index: 1, kind: input, shape index: {}]   ;;  %s454_s2 = inlined_call_operand.vmem [shape: f32[1,128], index: 2, kind: input, shape index: {}]   ;;  %s455_s3 = inlined_call_operand.vmem [shape: f32[128,8], index: 3, kind: input, shape index: {}]   ;;  %s456_s4 = inlined_call_operand.vmem [shape: f32[1,8], index: 4, kind: input, shape index: {}]   ;;  %s457_s5 = inlined_call_operand.hbm [shape: f32[8,8], index: 5, kind: output, shape index: {}]  }
   0x1   :  { %v22_v0 = vld [vmem:[%s453_s1] sm:$0xff]  ;;  %v23_v1 = vld [vmem:[%s453_s1 + $0x8] sm:$0xf]  ;;  %285 = vmatprep.subr.bf16.mxu0 %v342_v2  ;;  %vm287_vm2 = vmpackc.low %vm35_vm0, %vm343_vm1  ;;  %289 = vmatprep.subr.bf16.mxu1 %v342_v2  ;;  %v345_v5 = vmov 0.0   ;;  %vm31_vm4 = vcmask 97280  }
   0x2   :  { %v286_v3 = vpack.c.bf16 %v23_v1, %v22_v0  ;;  %v110_v4 = vld [vmem:[%s455_s3] sm:$0xff]  ;;  %247 = vmatprep.mubr.msk.f32.mxu0 %vm344_vm3, %v345_v5  ;;  %v111_v6 = vld [vmem:[%s455_s3 + $0x8] sm:$0xff]  ;;  %v112_v7 = vld [vmem:[%s455_s3 + $0x10] sm:$0xff]  ;;  %282 = vmatprep.mubr.msk.f32.mxu1 %vm344_vm3, %v345_v5 }
   0x3   :  { %v113_v8 = vld [vmem:[%s455_s3 + $0x18] sm:$0xff]  ;;  %v21_v9 = vld [vmem:[%s452_s0] sm:$0xff]  ;;  %v290_v10 = vpack.c.bf16 %v111_v6, %v110_v4  ;;  %v115_v13 = vld [vmem:[%s455_s3 + $0x28] sm:$0xff] }
   0x4   :  { %288 = vmatpush3.bf16.msk.msra.mxu0 %vm287_vm2, %v286_v3  ;;  %v293_v11 = vpack.c.bf16 %v113_v8, %v112_v7  ;;  %v114_v12 = vld [vmem:[%s455_s3 + $0x20] sm:$0xff] }
   0x5   :  { %291 = vmatpush3.bf16.msra.mxu1 %v290_v10 }
   0x6   :  { %292 = vmatprep.subr.bf16.mxu1 %v342_v2 }
   0x7   :  { %248 = vmatmul.mubr.msk.f32.vlgmr.msra.gmra.mrb[0].mxu0 %vm31_vm4, %v21_v9 }
   0x8   :  { %10 = vsyncpa [#allocation3], 0  ;;  %v296_v14 = vpack.c.bf16 %v115_v13, %v114_v12  ;;  %v116_v15 = vld [vmem:[%s455_s3 + $0x30] sm:$0xff]  ;;  %v117_v16 = vld [vmem:[%s455_s3 + $0x38] sm:$0xff]  ;;  %s346_s7 = smov [#allocation2]   ;;  %vm203_vm5 = vcmask 64512  }
   0x9   :  { %294 = vmatpush3.bf16.msra.mxu1 %v293_v11  ;;  %v299_v17 = vpack.c.bf16 %v117_v16, %v116_v15  ;;  %v118_v18 = vld [vmem:[%s455_s3 + $0x40] sm:$0xff]  ;;  %v119_v19 = vld [vmem:[%s455_s3 + $0x48] sm:$0xff]  ;;  %v120_v21 = vld [vmem:[%s455_s3 + $0x50] sm:$0xff]  ;;  %s211_s8 = sshll.u32 %s346_s7, 4  ;;  %s212_s8 = int_to_ptr.vmem [resolvable:$true] %s211_s8 }
   0xa   :  { %295 = vmatprep.subr.bf16.mxu1 %v342_v2  ;;  %v302_v20 = vpack.c.bf16 %v119_v19, %v118_v18  ;;  %v121_v22 = vld [vmem:[%s455_s3 + $0x58] sm:$0xff]  ;;  %v122_v24 = vld [vmem:[%s455_s3 + $0x60] sm:$0xff]  ;;  %v123_v25 = vld [vmem:[%s455_s3 + $0x68] sm:$0xff]  ;;  %p323_p1 = scmp.lt.s32.totalorder %s212_s8, %s212_s8 }
   0xb   :  { %v305_v23 = vpack.c.bf16 %v121_v22, %v120_v21  ;;  %v308_v26 = vpack.c.bf16 %v123_v25, %v122_v24  ;;  %v124_v27 = vld [vmem:[%s455_s3 + $0x70] sm:$0xff]  ;;  %v125_v28 = vld [vmem:[%s455_s3 + $0x78] sm:$0xff]  ;;  %v219_v30 = vld [vmem:[%s454_s2] ss:$0 sm:$0xff]  ;;  %s318_s3 = scalar_lea.vmem %s212_s8, 128 }
   0xc   :  { %v311_v29 = vpack.c.bf16 %v125_v28, %v124_v27  ;;  %v222_v35 = vld [vmem:[%s456_s4] ss:$0 sm:$0xff]  ;;  %p319_p0 = scmp.ne.s32.totalorder %s212_s8, %s318_s3  ;;  %p324_p2 = scmp.lt.s32.totalorder %s318_s3, %s318_s3 }
   0xd   :  { %297 = vmatpush3.bf16.msra.mxu1 %v296_v14 }
   0xe   :  { %298 = vmatprep.subr.bf16.mxu1 %v342_v2  ;;  %p325_p3 = por %p324_p2, %p323_p1 }
  0x10   :  { %p326_p4 = pnand %p325_p3, %p319_p0 }
  0x11   :  { %300 = vmatpush3.bf16.msra.mxu1 %v299_v17 }
  0x12   :  { %301 = vmatprep.subr.bf16.mxu1 %v342_v2 }
  0x15   :  { %303 = vmatpush3.bf16.msra.mxu1 %v302_v20 }
  0x16   :  { %304 = vmatprep.subr.bf16.mxu1 %v342_v2 }
  0x19   :  { %306 = vmatpush3.bf16.msra.mxu1 %v305_v23 }
  0x1a   :  { %307 = vmatprep.subr.bf16.mxu1 %v342_v2 }
  0x1d   :  { %309 = vmatpush3.bf16.msra.mxu1 %v308_v26 }
  0x1e   :  { %310 = vmatprep.subr.bf16.mxu1 %v342_v2 }
  0x21   :  { %312 = vmatpush3.bf16.msra.mxu1 %v311_v29 }
  0xda   :  { %v105_v31 = vpop.f32.mrb[0].mxu0 }
  0xdb   :  { %v106_v32 = vadd.f32 %v219_v30, %v105_v31  ;;  %v249_v33 = vpop.f32.mrb[1].mxu0 }
  0xdd   :  { %v109_v34 = vmax.f32 %v106_v32, 0.0 }
  0xdf   :  { %283 = vmatmul.mubr.f32.vlgmr.msra.gmra.mrb[0].mxu1 %v109_v34 }
 0x1b2   :  { %v199_v36 = vpop.f32.mrb[0].mxu1 }
 0x1b3   :  { %v200_v37 = vadd.f32 %v222_v35, %v199_v36  ;;  %v284_v38 = vpop.f32.mrb[1].mxu1 }
 0x1b5   :  { %204 = vst.msk [vmem:[#allocation2] sm:$0xff] %vm203_vm5, %v200_v37 }
 0x1b6   :  { %329 = shalt.err (!%p326_p4)
}
 0x1b7   :  { %s330_s10 = scalar_lea.hbm %s457_s5, 128 }
 0x1b8   :  { %p331_p5 = scmp.ne.s32.totalorder %s457_s5, %s330_s10  ;;  %p334_p6 = scmp.lt.u32.totalorder %s330_s10, %s457_s5 }
 0x1ba   :  { %p336_p7 = pnand %p334_p6, %p331_p5 }
 0x1bc   :  { %339 = shalt.err (!%p336_p7)
}
 0x1bd   :  { %214 = dma.vmem_to_hbm [thread:$0]  %s212_s8, 128, %s457_s5, [#allocation3]  }
 0x1be   :  { %340 = dma.done.wait [#allocation3], 128  }
 0x1bf   :  { %341 = vsyncadd [#allocation3], 4294967168 }
 0x1c0   :  { %218 = vsyncpa [#allocation3], 1 }

</bundles_post_ra>
